<compile_context>
chip_gen: v5e
topology: v5e:2x2
jax: 0.10.0
libtpu: 0.0.40
codegen_flags: <defaults>
</compile_context>

<pallas_src>
import functools

import jax
import jax.numpy as jnp
from jax.experimental import pallas as pl
from jax.experimental.pallas import tpu as pltpu


def _decoder_kernel(x_ref, zb_ref,
                    w1x_ref,
                    w2_ref, b2_ref,
                    w3_ref, b3_ref,
                    w4_ref, b4_ref,
                    w5_ref, b5_ref,
                    out_ref, *, n_slots):
    """One (batch b', point-tile) step: full MLP for all K slots of the tile.

    x_ref  : (tile_m, x_dim)      points of this tile
    zb_ref : (K, 2h)              hoisted z-bias for this batch element
    out_ref: (tile_m, K*3)        K slot outputs packed along lanes
    """
    x = x_ref[...]
    # Layer-1 x projection: computed ONCE per point, reused for all K slots.
    h1x = jnp.dot(x, w1x_ref[...], preferred_element_type=jnp.float32)

    zb = zb_ref[...]
    w2, b2 = w2_ref[...], b2_ref[...]
    w3, b3 = w3_ref[...], b3_ref[...]
    w4, b4 = w4_ref[...], b4_ref[...]
    w5, b5 = w5_ref[...], b5_ref[...]

    outs = []
    for k in range(n_slots):                       # static unroll, K is small
        # Layer 1: relu(x@W1x + (zg@W1g + zl@W1l + b1))  (z part precomputed)
        h = jnp.maximum(h1x + zb[k:k + 1, :], 0.0)
        # Layer 2 + ReLU
        h = jnp.maximum(jnp.dot(h, w2, preferred_element_type=jnp.float32) + b2, 0.0)
        # Layer 3 + ReLU
        h = jnp.maximum(jnp.dot(h, w3, preferred_element_type=jnp.float32) + b3, 0.0)
        # Shared head layer 1 + ReLU
        h = jnp.maximum(jnp.dot(h, w4, preferred_element_type=jnp.float32) + b4, 0.0)
        # Shared head layer 2 (no activation)
        outs.append(jnp.dot(h, w5, preferred_element_type=jnp.float32) + b5)

    # Single lane-packed store for the whole tile: (tile_m, K*3).
    out_ref[...] = jnp.concatenate(outs, axis=-1).astype(out_ref.dtype)


def init_decoder_all_params(key, x_dim, z_dim, h_dim, n_kps=8, dtype=jnp.float32):
    """Deterministic synthetic parameter init (weights stored (in, out))."""
    assert x_dim == z_dim, "forward's concat requires x_dim == z_dim"
    ks = jax.random.split(key, 10)

    def w(k, fan_in, fan_out):
        return (jax.random.normal(k, (fan_in, fan_out), dtype) / jnp.sqrt(fan_in)).astype(dtype)

    def b(k, fan_out):
        return (0.01 * jax.random.normal(k, (1, fan_out), dtype)).astype(dtype)

    d_in = 3 * x_dim
    params = {
        # xz_to_hidden
        "w1": w(ks[0], d_in, 2 * h_dim), "b1": b(ks[1], 2 * h_dim),
        "w2": w(ks[2], 2 * h_dim, h_dim), "b2": b(ks[3], h_dim),
        "w3": w(ks[4], h_dim, h_dim),     "b3": b(ks[5], h_dim),
        # shared head (hidden_to_kps and hidden_to_ctr share parameters)
        "w4": w(ks[6], h_dim, h_dim // 2), "b4": b(ks[7], h_dim // 2),
        "w5": w(ks[8], h_dim // 2, 3),     "b5": b(ks[9], 3),
    }
    return params


@functools.partial(jax.jit, static_argnames=("n_kps", "tile_m"))
def decoder_all_forward(x, z_g, z_l, params, n_kps=8, tile_m=1024):
    """Pallas forward of Decoder_all.

    x   : (bs', M, x_dim)
    z_g : (bs, 1, z_dim)
    z_l : (bs, 1, n_kps+1, z_dim)
    returns (pred_kp_ofs (bs',M,n_kps,3), pred_ctr_ofs (bs',M,1,3))
    """
    bsp, num_points, x_dim = x.shape
    bs = z_g.shape[0]
    z_dim = z_g.shape[-1]
    K = n_kps + 1

    # ---- hoisted z-dependent layer-1 term (tiny: bs*K rows) -----------------
    # zbias[b, k, :] = z_g[b] @ W1g + z_l[b, k] @ W1l + b1
    w1 = params["w1"]
    w1x = w1[:x_dim]
    w1g = w1[x_dim:x_dim + z_dim]
    w1l = w1[x_dim + z_dim:]
    zg2 = z_g[:, 0, :]                                     # (bs, z_dim)
    zl3 = z_l[:, 0, :, :]                                  # (bs, K, z_dim)
    zbias = (jnp.einsum("bd,dh->bh", zg2, w1g)[:, None, :]
             + jnp.einsum("bkd,dh->bkh", zl3, w1l)
             + params["b1"])                               # (bs, K, 2h)
    # Replicate across the task axis exactly like torch.tile (b' -> b' % bs).
    zbias_full = jnp.tile(zbias, (bsp // bs, 1, 1))        # (bsp, K, 2h) — tiny

    h2 = w1.shape[1]                                       # 2 * h_dim

    # ---- point tiling --------------------------------------------------------
    # Sublane constraint: tile_m must be a multiple of 8 or equal num_points.
    if num_points <= 8:
        tm = num_points
    else:
        tm = min(tile_m, num_points)
        tm = max(8, (tm // 8) * 8)
    n_m_tiles = pl.cdiv(num_points, tm)
    grid = (bsp, n_m_tiles)

    weights = (w1x,
               params["w2"], params["b2"],
               params["w3"], params["b3"],
               params["w4"], params["b4"],
               params["w5"], params["b5"])
    weight_specs = [pl.BlockSpec(w.shape, lambda b, j: (0, 0)) for w in weights]

    out_flat = pl.pallas_call(
        functools.partial(_decoder_kernel, n_slots=K),
        out_shape=jax.ShapeDtypeStruct((bsp, num_points, K * 3), jnp.float32),
        grid_spec=pltpu.PrefetchScalarGridSpec(
            num_scalar_prefetch=0,
            grid=grid,
            in_specs=[
                pl.BlockSpec((None, tm, x_dim), lambda b, j: (b, j, 0)),   # x
                pl.BlockSpec((None, K, h2), lambda b, j: (b, 0, 0)),       # zbias
            ] + weight_specs,
            out_specs=pl.BlockSpec((None, tm, K * 3), lambda b, j: (b, j, 0)),
        ),
        compiler_params=pltpu.CompilerParams(
            dimension_semantics=("parallel", "parallel")),
    )(x, zbias_full, *weights)

    out = out_flat.reshape(bsp, num_points, K, 3)
    pred_kp_ofs = out[:, :, :n_kps, :]          # (bs', M, n_kps, 3)
    pred_ctr_ofs = out[:, :, n_kps:, :]         # (bs', M, 1, 3)
    return pred_kp_ofs, pred_ctr_ofs


def _reference_forward(x, z_g, z_l, params, n_kps=8):
    """Pure-JAX reference mirroring the PyTorch forward exactly."""
    bsp, M, x_dim = x.shape
    bs, _, z_dim = z_g.shape
    K = n_kps + 1
    x4 = jnp.broadcast_to(x[:, :, None, :], (bsp, M, K, x_dim))
    zg4 = jnp.tile(jnp.broadcast_to(z_g[:, None, :, :], (bs, M, K, z_dim)),
                   (bsp // bs, 1, 1, 1))
    zl4 = jnp.tile(jnp.broadcast_to(z_l, (bs, M, K, z_dim)), (bsp // bs, 1, 1, 1))
    pairs = jnp.concatenate([x4, zg4, zl4], axis=-1)

    def mlp(v):
        h = jnp.maximum(v @ params["w1"] + params["b1"][0], 0.0)
        h = jnp.maximum(h @ params["w2"] + params["b2"][0], 0.0)
        h = jnp.maximum(h @ params["w3"] + params["b3"][0], 0.0)
        h = jnp.maximum(h @ params["w4"] + params["b4"][0], 0.0)
        return h @ params["w5"] + params["b5"][0]

    kp = mlp(pairs[:, :, :n_kps, :])
    ctr = mlp(pairs[:, :, -1, :]).reshape(bsp, M, 1, 3)
    return kp, ctr


if __name__ == "__main__":
    # small shapes consistent with the forward: x_dim == z_dim, bs' multiple of bs
    x_dim = z_dim = 32
    h_dim = 32
    n_kps = 8
    bs, bsp, M = 2, 4, 8

    key = jax.random.PRNGKey(0)
    k_params, k_x, k_zg, k_zl = jax.random.split(key, 4)
    params = init_decoder_all_params(k_params, x_dim, z_dim, h_dim, n_kps)

    x = jax.random.normal(k_x, (bsp, M, x_dim), jnp.float32)
    z_g = jax.random.normal(k_zg, (bs, 1, z_dim), jnp.float32)
    z_l = jax.random.normal(k_zl, (bs, 1, n_kps + 1, z_dim), jnp.float32)

    pred_kp, pred_ctr = decoder_all_forward(x, z_g, z_l, params, n_kps=n_kps)
    jax.block_until_ready((pred_kp, pred_ctr))

    ref_kp, ref_ctr = _reference_forward(x, z_g, z_l, params, n_kps=n_kps)
    assert pred_kp.shape == (bsp, M, n_kps, 3)
    assert pred_ctr.shape == (bsp, M, 1, 3)
    assert jnp.allclose(pred_kp, ref_kp, atol=1e-4, rtol=1e-4)
    assert jnp.allclose(pred_ctr, ref_ctr, atol=1e-4, rtol=1e-4)

    # TODO(synk): optional bf16 casting of x / weights (with f32 accumulation)
    # would halve HBM bytes on v6e/v7x; kept f32 here to match PyTorch numerics.
    print("KERNEL_OK")
</pallas_src>

<mosaic_0001>
module attributes {stable_mosaic.version = 11 : i64} {
  func.func @_decoder_kernel(%arg0: i32, %arg1: i32, %arg2: memref<1x8x32xf32, #tpu.memory_space<vmem>>, %arg3: memref<1x9x64xf32, #tpu.memory_space<vmem>>, %arg4: memref<32x64xf32, #tpu.memory_space<vmem>>, %arg5: memref<64x32xf32, #tpu.memory_space<vmem>>, %arg6: memref<1x32xf32, #tpu.memory_space<vmem>>, %arg7: memref<32x32xf32, #tpu.memory_space<vmem>>, %arg8: memref<1x32xf32, #tpu.memory_space<vmem>>, %arg9: memref<32x16xf32, #tpu.memory_space<vmem>>, %arg10: memref<1x16xf32, #tpu.memory_space<vmem>>, %arg11: memref<16x3xf32, #tpu.memory_space<vmem>>, %arg12: memref<1x3xf32, #tpu.memory_space<vmem>>, %arg13: memref<1x8x27xf32, #tpu.memory_space<vmem>>) attributes {dimension_semantics = [#tpu.dimension_semantics<parallel>, #tpu.dimension_semantics<parallel>], iteration_bounds = array<i64: 4, 1>, scalar_prefetch = 0 : i64, scratch_operands = 0 : i64, tpu.core_type = #tpu.core_type<tc>, window_params = [{transform_indices = @transform_0, window_bounds = array<i64: 1, 8, 32>}, {transform_indices = @transform_1, window_bounds = array<i64: 1, 9, 64>}, {pipeline_mode = #tpu.pipeline_mode<synchronous>, transform_indices = @transform_2, window_bounds = array<i64: 32, 64>}, {pipeline_mode = #tpu.pipeline_mode<synchronous>, transform_indices = @transform_3, window_bounds = array<i64: 64, 32>}, {pipeline_mode = #tpu.pipeline_mode<synchronous>, transform_indices = @transform_4, window_bounds = array<i64: 1, 32>}, {pipeline_mode = #tpu.pipeline_mode<synchronous>, transform_indices = @transform_5, window_bounds = array<i64: 32, 32>}, {pipeline_mode = #tpu.pipeline_mode<synchronous>, transform_indices = @transform_6, window_bounds = array<i64: 1, 32>}, {pipeline_mode = #tpu.pipeline_mode<synchronous>, transform_indices = @transform_7, window_bounds = array<i64: 32, 16>}, {pipeline_mode = #tpu.pipeline_mode<synchronous>, transform_indices = @transform_8, window_bounds = array<i64: 1, 16>}, {pipeline_mode = #tpu.pipeline_mode<synchronous>, transform_indices = @transform_9, window_bounds = array<i64: 16, 3>}, {pipeline_mode = #tpu.pipeline_mode<synchronous>, transform_indices = @transform_10, window_bounds = array<i64: 1, 3>}, {transform_indices = @transform_11, window_bounds = array<i64: 1, 8, 27>}]} {
    %c0 = arith.constant 0 : index
    %c0_0 = arith.constant 0 : index
    %c0_1 = arith.constant 0 : index
    %0 = vector.load %arg2[%c0, %c0_0, %c0_1] : memref<1x8x32xf32, #tpu.memory_space<vmem>>, vector<1x8x32xf32>
    %1 = vector.shape_cast %0 : vector<1x8x32xf32> to vector<8x32xf32>
    %c0_2 = arith.constant 0 : index
    %c0_3 = arith.constant 0 : index
    %2 = vector.load %arg4[%c0_2, %c0_3] : memref<32x64xf32, #tpu.memory_space<vmem>>, vector<32x64xf32>
    %cst = arith.constant dense<0.000000e+00> : vector<8x64xf32>
    %3 = tpu.matmul %1, %2, %cst {dimension_numbers = #tpu.dot_dimension_numbers<[1], [0], [0], [1], [0, 0, 1, 1], [], []>} : vector<8x32xf32>, vector<32x64xf32>, vector<8x64xf32> -> vector<8x64xf32>
    %c0_4 = arith.constant 0 : index
    %c0_5 = arith.constant 0 : index
    %c0_6 = arith.constant 0 : index
    %4 = vector.load %arg3[%c0_4, %c0_5, %c0_6] : memref<1x9x64xf32, #tpu.memory_space<vmem>>, vector<1x9x64xf32>
    %5 = vector.shape_cast %4 : vector<1x9x64xf32> to vector<9x64xf32>
    %c0_7 = arith.constant 0 : index
    %c0_8 = arith.constant 0 : index
    %6 = vector.load %arg5[%c0_7, %c0_8] : memref<64x32xf32, #tpu.memory_space<vmem>>, vector<64x32xf32>
    %c0_9 = arith.constant 0 : index
    %c0_10 = arith.constant 0 : index
    %7 = vector.load %arg6[%c0_9, %c0_10] : memref<1x32xf32, #tpu.memory_space<vmem>>, vector<1x32xf32>
    %c0_11 = arith.constant 0 : index
    %c0_12 = arith.constant 0 : index
    %8 = vector.load %arg7[%c0_11, %c0_12] : memref<32x32xf32, #tpu.memory_space<vmem>>, vector<32x32xf32>
    %c0_13 = arith.constant 0 : index
    %c0_14 = arith.constant 0 : index
    %9 = vector.load %arg8[%c0_13, %c0_14] : memref<1x32xf32, #tpu.memory_space<vmem>>, vector<1x32xf32>
    %c0_15 = arith.constant 0 : index
    %c0_16 = arith.constant 0 : index
    %10 = vector.load %arg9[%c0_15, %c0_16] : memref<32x16xf32, #tpu.memory_space<vmem>>, vector<32x16xf32>
    %c0_17 = arith.constant 0 : index
    %c0_18 = arith.constant 0 : index
    %11 = vector.load %arg10[%c0_17, %c0_18] : memref<1x16xf32, #tpu.memory_space<vmem>>, vector<1x16xf32>
    %c0_19 = arith.constant 0 : index
    %c0_20 = arith.constant 0 : index
    %12 = vector.load %arg11[%c0_19, %c0_20] : memref<16x3xf32, #tpu.memory_space<vmem>>, vector<16x3xf32>
    %c0_21 = arith.constant 0 : index
    %c0_22 = arith.constant 0 : index
    %13 = vector.load %arg12[%c0_21, %c0_22] : memref<1x3xf32, #tpu.memory_space<vmem>>, vector<1x3xf32>
    %14 = vector.extract_strided_slice %5 {offsets = [0, 0], sizes = [1, 64], strides = [1, 1]} : vector<9x64xf32> to vector<1x64xf32>
    %15 = vector.broadcast %14 : vector<1x64xf32> to vector<8x64xf32>
    %16 = arith.addf %3, %15 : vector<8x64xf32>
    %cst_23 = arith.constant 0.000000e+00 : f32
    %17 = vector.broadcast %cst_23 : f32 to vector<8x64xf32>
    %18 = arith.maximumf %16, %17 : vector<8x64xf32>
    %cst_24 = arith.constant dense<0.000000e+00> : vector<8x32xf32>
    %19 = tpu.matmul %18, %6, %cst_24 {dimension_numbers = #tpu.dot_dimension_numbers<[1], [0], [0], [1], [0, 0, 1, 1], [], []>} : vector<8x64xf32>, vector<64x32xf32>, vector<8x32xf32> -> vector<8x32xf32>
    %20 = vector.broadcast %7 : vector<1x32xf32> to vector<8x32xf32>
    %21 = arith.addf %19, %20 : vector<8x32xf32>
    %cst_25 = arith.constant 0.000000e+00 : f32
    %22 = vector.broadcast %cst_25 : f32 to vector<8x32xf32>
    %23 = arith.maximumf %21, %22 : vector<8x32xf32>
    %cst_26 = arith.constant dense<0.000000e+00> : vector<8x32xf32>
    %24 = tpu.matmul %23, %8, %cst_26 {dimension_numbers = #tpu.dot_dimension_numbers<[1], [0], [0], [1], [0, 0, 1, 1], [], []>} : vector<8x32xf32>, vector<32x32xf32>, vector<8x32xf32> -> vector<8x32xf32>
    %25 = vector.broadcast %9 : vector<1x32xf32> to vector<8x32xf32>
    %26 = arith.addf %24, %25 : vector<8x32xf32>
    %cst_27 = arith.constant 0.000000e+00 : f32
    %27 = vector.broadcast %cst_27 : f32 to vector<8x32xf32>
    %28 = arith.maximumf %26, %27 : vector<8x32xf32>
    %cst_28 = arith.constant dense<0.000000e+00> : vector<8x16xf32>
    %29 = tpu.matmul %28, %10, %cst_28 {dimension_numbers = #tpu.dot_dimension_numbers<[1], [0], [0], [1], [0, 0, 1, 1], [], []>} : vector<8x32xf32>, vector<32x16xf32>, vector<8x16xf32> -> vector<8x16xf32>
    %30 = vector.broadcast %11 : vector<1x16xf32> to vector<8x16xf32>
    %31 = arith.addf %29, %30 : vector<8x16xf32>
    %cst_29 = arith.constant 0.000000e+00 : f32
    %32 = vector.broadcast %cst_29 : f32 to vector<8x16xf32>
    %33 = arith.maximumf %31, %32 : vector<8x16xf32>
    %cst_30 = arith.constant dense<0.000000e+00> : vector<8x3xf32>
    %34 = tpu.matmul %33, %12, %cst_30 {dimension_numbers = #tpu.dot_dimension_numbers<[1], [0], [0], [1], [0, 0, 1, 1], [], []>} : vector<8x16xf32>, vector<16x3xf32>, vector<8x3xf32> -> vector<8x3xf32>
    %35 = vector.broadcast %13 : vector<1x3xf32> to vector<8x3xf32>
    %36 = arith.addf %34, %35 : vector<8x3xf32>
    %37 = vector.extract_strided_slice %5 {offsets = [1, 0], sizes = [1, 64], strides = [1, 1]} : vector<9x64xf32> to vector<1x64xf32>
    %38 = vector.broadcast %37 : vector<1x64xf32> to vector<8x64xf32>
    %39 = arith.addf %3, %38 : vector<8x64xf32>
    %cst_31 = arith.constant 0.000000e+00 : f32
    %40 = vector.broadcast %cst_31 : f32 to vector<8x64xf32>
    %41 = arith.maximumf %39, %40 : vector<8x64xf32>
    %cst_32 = arith.constant dense<0.000000e+00> : vector<8x32xf32>
    %42 = tpu.matmul %41, %6, %cst_32 {dimension_numbers = #tpu.dot_dimension_numbers<[1], [0], [0], [1], [0, 0, 1, 1], [], []>} : vector<8x64xf32>, vector<64x32xf32>, vector<8x32xf32> -> vector<8x32xf32>
    %43 = vector.broadcast %7 : vector<1x32xf32> to vector<8x32xf32>
    %44 = arith.addf %42, %43 : vector<8x32xf32>
    %cst_33 = arith.constant 0.000000e+00 : f32
    %45 = vector.broadcast %cst_33 : f32 to vector<8x32xf32>
    %46 = arith.maximumf %44, %45 : vector<8x32xf32>
    %cst_34 = arith.constant dense<0.000000e+00> : vector<8x32xf32>
    %47 = tpu.matmul %46, %8, %cst_34 {dimension_numbers = #tpu.dot_dimension_numbers<[1], [0], [0], [1], [0, 0, 1, 1], [], []>} : vector<8x32xf32>, vector<32x32xf32>, vector<8x32xf32> -> vector<8x32xf32>
    %48 = vector.broadcast %9 : vector<1x32xf32> to vector<8x32xf32>
    %49 = arith.addf %47, %48 : vector<8x32xf32>
    %cst_35 = arith.constant 0.000000e+00 : f32
    %50 = vector.broadcast %cst_35 : f32 to vector<8x32xf32>
    %51 = arith.maximumf %49, %50 : vector<8x32xf32>
    %cst_36 = arith.constant dense<0.000000e+00> : vector<8x16xf32>
    %52 = tpu.matmul %51, %10, %cst_36 {dimension_numbers = #tpu.dot_dimension_numbers<[1], [0], [0], [1], [0, 0, 1, 1], [], []>} : vector<8x32xf32>, vector<32x16xf32>, vector<8x16xf32> -> vector<8x16xf32>
    %53 = vector.broadcast %11 : vector<1x16xf32> to vector<8x16xf32>
    %54 = arith.addf %52, %53 : vector<8x16xf32>
    %cst_37 = arith.constant 0.000000e+00 : f32
    %55 = vector.broadcast %cst_37 : f32 to vector<8x16xf32>
    %56 = arith.maximumf %54, %55 : vector<8x16xf32>
    %cst_38 = arith.constant dense<0.000000e+00> : vector<8x3xf32>
    %57 = tpu.matmul %56, %12, %cst_38 {dimension_numbers = #tpu.dot_dimension_numbers<[1], [0], [0], [1], [0, 0, 1, 1], [], []>} : vector<8x16xf32>, vector<16x3xf32>, vector<8x3xf32> -> vector<8x3xf32>
    %58 = vector.broadcast %13 : vector<1x3xf32> to vector<8x3xf32>
    %59 = arith.addf %57, %58 : vector<8x3xf32>
    %60 = vector.extract_strided_slice %5 {offsets = [2, 0], sizes = [1, 64], strides = [1, 1]} : vector<9x64xf32> to vector<1x64xf32>
    %61 = vector.broadcast %60 : vector<1x64xf32> to vector<8x64xf32>
    %62 = arith.addf %3, %61 : vector<8x64xf32>
    %cst_39 = arith.constant 0.000000e+00 : f32
    %63 = vector.broadcast %cst_39 : f32 to vector<8x64xf32>
    %64 = arith.maximumf %62, %63 : vector<8x64xf32>
    %cst_40 = arith.constant dense<0.000000e+00> : vector<8x32xf32>
    %65 = tpu.matmul %64, %6, %cst_40 {dimension_numbers = #tpu.dot_dimension_numbers<[1], [0], [0], [1], [0, 0, 1, 1], [], []>} : vector<8x64xf32>, vector<64x32xf32>, vector<8x32xf32> -> vector<8x32xf32>
    %66 = vector.broadcast %7 : vector<1x32xf32> to vector<8x32xf32>
    %67 = arith.addf %65, %66 : vector<8x32xf32>
    %cst_41 = arith.constant 0.000000e+00 : f32
    %68 = vector.broadcast %cst_41 : f32 to vector<8x32xf32>
    %69 = arith.maximumf %67, %68 : vector<8x32xf32>
    %cst_42 = arith.constant dense<0.000000e+00> : vector<8x32xf32>
    %70 = tpu.matmul %69, %8, %cst_42 {dimension_numbers = #tpu.dot_dimension_numbers<[1], [0], [0], [1], [0, 0, 1, 1], [], []>} : vector<8x32xf32>, vector<32x32xf32>, vector<8x32xf32> -> vector<8x32xf32>
    %71 = vector.broadcast %9 : vector<1x32xf32> to vector<8x32xf32>
    %72 = arith.addf %70, %71 : vector<8x32xf32>
    %cst_43 = arith.constant 0.000000e+00 : f32
    %73 = vector.broadcast %cst_43 : f32 to vector<8x32xf32>
    %74 = arith.maximumf %72, %73 : vector<8x32xf32>
    %cst_44 = arith.constant dense<0.000000e+00> : vector<8x16xf32>
    %75 = tpu.matmul %74, %10, %cst_44 {dimension_numbers = #tpu.dot_dimension_numbers<[1], [0], [0], [1], [0, 0, 1, 1], [], []>} : vector<8x32xf32>, vector<32x16xf32>, vector<8x16xf32> -> vector<8x16xf32>
    %76 = vector.broadcast %11 : vector<1x16xf32> to vector<8x16xf32>
    %77 = arith.addf %75, %76 : vector<8x16xf32>
    %cst_45 = arith.constant 0.000000e+00 : f32
    %78 = vector.broadcast %cst_45 : f32 to vector<8x16xf32>
    %79 = arith.maximumf %77, %78 : vector<8x16xf32>
    %cst_46 = arith.constant dense<0.000000e+00> : vector<8x3xf32>
    %80 = tpu.matmul %79, %12, %cst_46 {dimension_numbers = #tpu.dot_dimension_numbers<[1], [0], [0], [1], [0, 0, 1, 1], [], []>} : vector<8x16xf32>, vector<16x3xf32>, vector<8x3xf32> -> vector<8x3xf32>
    %81 = vector.broadcast %13 : vector<1x3xf32> to vector<8x3xf32>
    %82 = arith.addf %80, %81 : vector<8x3xf32>
    %83 = vector.extract_strided_slice %5 {offsets = [3, 0], sizes = [1, 64], strides = [1, 1]} : vector<9x64xf32> to vector<1x64xf32>
    %84 = vector.broadcast %83 : vector<1x64xf32> to vector<8x64xf32>
    %85 = arith.addf %3, %84 : vector<8x64xf32>
    %cst_47 = arith.constant 0.000000e+00 : f32
    %86 = vector.broadcast %cst_47 : f32 to vector<8x64xf32>
    %87 = arith.maximumf %85, %86 : vector<8x64xf32>
    %cst_48 = arith.constant dense<0.000000e+00> : vector<8x32xf32>
    %88 = tpu.matmul %87, %6, %cst_48 {dimension_numbers = #tpu.dot_dimension_numbers<[1], [0], [0], [1], [0, 0, 1, 1], [], []>} : vector<8x64xf32>, vector<64x32xf32>, vector<8x32xf32> -> vector<8x32xf32>
    %89 = vector.broadcast %7 : vector<1x32xf32> to vector<8x32xf32>
    %90 = arith.addf %88, %89 : vector<8x32xf32>
    %cst_49 = arith.constant 0.000000e+00 : f32
    %91 = vector.broadcast %cst_49 : f32 to vector<8x32xf32>
    %92 = arith.maximumf %90, %91 : vector<8x32xf32>
    %cst_50 = arith.constant dense<0.000000e+00> : vector<8x32xf32>
    %93 = tpu.matmul %92, %8, %cst_50 {dimension_numbers = #tpu.dot_dimension_numbers<[1], [0], [0], [1], [0, 0, 1, 1], [], []>} : vector<8x32xf32>, vector<32x32xf32>, vector<8x32xf32> -> vector<8x32xf32>
    %94 = vector.broadcast %9 : vector<1x32xf32> to vector<8x32xf32>
    %95 = arith.addf %93, %94 : vector<8x32xf32>
    %cst_51 = arith.constant 0.000000e+00 : f32
    %96 = vector.broadcast %cst_51 : f32 to vector<8x32xf32>
    %97 = arith.maximumf %95, %96 : vector<8x32xf32>
    %cst_52 = arith.constant dense<0.000000e+00> : vector<8x16xf32>
    %98 = tpu.matmul %97, %10, %cst_52 {dimension_numbers = #tpu.dot_dimension_numbers<[1], [0], [0], [1], [0, 0, 1, 1], [], []>} : vector<8x32xf32>, vector<32x16xf32>, vector<8x16xf32> -> vector<8x16xf32>
    %99 = vector.broadcast %11 : vector<1x16xf32> to vector<8x16xf32>
    %100 = arith.addf %98, %99 : vector<8x16xf32>
    %cst_53 = arith.constant 0.000000e+00 : f32
    %101 = vector.broadcast %cst_53 : f32 to vector<8x16xf32>
    %102 = arith.maximumf %100, %101 : vector<8x16xf32>
    %cst_54 = arith.constant dense<0.000000e+00> : vector<8x3xf32>
    %103 = tpu.matmul %102, %12, %cst_54 {dimension_numbers = #tpu.dot_dimension_numbers<[1], [0], [0], [1], [0, 0, 1, 1], [], []>} : vector<8x16xf32>, vector<16x3xf32>, vector<8x3xf32> -> vector<8x3xf32>
    %104 = vector.broadcast %13 : vector<1x3xf32> to vector<8x3xf32>
    %105 = arith.addf %103, %104 : vector<8x3xf32>
    %106 = vector.extract_strided_slice %5 {offsets = [4, 0], sizes = [1, 64], strides = [1, 1]} : vector<9x64xf32> to vector<1x64xf32>
    %107 = vector.broadcast %106 : vector<1x64xf32> to vector<8x64xf32>
    %108 = arith.addf %3, %107 : vector<8x64xf32>
    %cst_55 = arith.constant 0.000000e+00 : f32
    %109 = vector.broadcast %cst_55 : f32 to vector<8x64xf32>
    %110 = arith.maximumf %108, %109 : vector<8x64xf32>
    %cst_56 = arith.constant dense<0.000000e+00> : vector<8x32xf32>
    %111 = tpu.matmul %110, %6, %cst_56 {dimension_numbers = #tpu.dot_dimension_numbers<[1], [0], [0], [1], [0, 0, 1, 1], [], []>} : vector<8x64xf32>, vector<64x32xf32>, vector<8x32xf32> -> vector<8x32xf32>
    %112 = vector.broadcast %7 : vector<1x32xf32> to vector<8x32xf32>
    %113 = arith.addf %111, %112 : vector<8x32xf32>
    %cst_57 = arith.constant 0.000000e+00 : f32
    %114 = vector.broadcast %cst_57 : f32 to vector<8x32xf32>
    %115 = arith.maximumf %113, %114 : vector<8x32xf32>
    %cst_58 = arith.constant dense<0.000000e+00> : vector<8x32xf32>
    %116 = tpu.matmul %115, %8, %cst_58 {dimension_numbers = #tpu.dot_dimension_numbers<[1], [0], [0], [1], [0, 0, 1, 1], [], []>} : vector<8x32xf32>, vector<32x32xf32>, vector<8x32xf32> -> vector<8x32xf32>
    %117 = vector.broadcast %9 : vector<1x32xf32> to vector<8x32xf32>
    %118 = arith.addf %116, %117 : vector<8x32xf32>
    %cst_59 = arith.constant 0.000000e+00 : f32
    %119 = vector.broadcast %cst_59 : f32 to vector<8x32xf32>
    %120 = arith.maximumf %118, %119 : vector<8x32xf32>
    %cst_60 = arith.constant dense<0.000000e+00> : vector<8x16xf32>
    %121 = tpu.matmul %120, %10, %cst_60 {dimension_numbers = #tpu.dot_dimension_numbers<[1], [0], [0], [1], [0, 0, 1, 1], [], []>} : vector<8x32xf32>, vector<32x16xf32>, vector<8x16xf32> -> vector<8x16xf32>
    %122 = vector.broadcast %11 : vector<1x16xf32> to vector<8x16xf32>
    %123 = arith.addf %121, %122 : vector<8x16xf32>
    %cst_61 = arith.constant 0.000000e+00 : f32
    %124 = vector.broadcast %cst_61 : f32 to vector<8x16xf32>
    %125 = arith.maximumf %123, %124 : vector<8x16xf32>
    %cst_62 = arith.constant dense<0.000000e+00> : vector<8x3xf32>
    %126 = tpu.matmul %125, %12, %cst_62 {dimension_numbers = #tpu.dot_dimension_numbers<[1], [0], [0], [1], [0, 0, 1, 1], [], []>} : vector<8x16xf32>, vector<16x3xf32>, vector<8x3xf32> -> vector<8x3xf32>
    %127 = vector.broadcast %13 : vector<1x3xf32> to vector<8x3xf32>
    %128 = arith.addf %126, %127 : vector<8x3xf32>
    %129 = vector.extract_strided_slice %5 {offsets = [5, 0], sizes = [1, 64], strides = [1, 1]} : vector<9x64xf32> to vector<1x64xf32>
    %130 = vector.broadcast %129 : vector<1x64xf32> to vector<8x64xf32>
    %131 = arith.addf %3, %130 : vector<8x64xf32>
    %cst_63 = arith.constant 0.000000e+00 : f32
    %132 = vector.broadcast %cst_63 : f32 to vector<8x64xf32>
    %133 = arith.maximumf %131, %132 : vector<8x64xf32>
    %cst_64 = arith.constant dense<0.000000e+00> : vector<8x32xf32>
    %134 = tpu.matmul %133, %6, %cst_64 {dimension_numbers = #tpu.dot_dimension_numbers<[1], [0], [0], [1], [0, 0, 1, 1], [], []>} : vector<8x64xf32>, vector<64x32xf32>, vector<8x32xf32> -> vector<8x32xf32>
    %135 = vector.broadcast %7 : vector<1x32xf32> to vector<8x32xf32>
    %136 = arith.addf %134, %135 : vector<8x32xf32>
    %cst_65 = arith.constant 0.000000e+00 : f32
    %137 = vector.broadcast %cst_65 : f32 to vector<8x32xf32>
    %138 = arith.maximumf %136, %137 : vector<8x32xf32>
    %cst_66 = arith.constant dense<0.000000e+00> : vector<8x32xf32>
    %139 = tpu.matmul %138, %8, %cst_66 {dimension_numbers = #tpu.dot_dimension_numbers<[1], [0], [0], [1], [0, 0, 1, 1], [], []>} : vector<8x32xf32>, vector<32x32xf32>, vector<8x32xf32> -> vector<8x32xf32>
    %140 = vector.broadcast %9 : vector<1x32xf32> to vector<8x32xf32>
    %141 = arith.addf %139, %140 : vector<8x32xf32>
    %cst_67 = arith.constant 0.000000e+00 : f32
    %142 = vector.broadcast %cst_67 : f32 to vector<8x32xf32>
    %143 = arith.maximumf %141, %142 : vector<8x32xf32>
    %cst_68 = arith.constant dense<0.000000e+00> : vector<8x16xf32>
    %144 = tpu.matmul %143, %10, %cst_68 {dimension_numbers = #tpu.dot_dimension_numbers<[1], [0], [0], [1], [0, 0, 1, 1], [], []>} : vector<8x32xf32>, vector<32x16xf32>, vector<8x16xf32> -> vector<8x16xf32>
    %145 = vector.broadcast %11 : vector<1x16xf32> to vector<8x16xf32>
    %146 = arith.addf %144, %145 : vector<8x16xf32>
    %cst_69 = arith.constant 0.000000e+00 : f32
    %147 = vector.broadcast %cst_69 : f32 to vector<8x16xf32>
    %148 = arith.maximumf %146, %147 : vector<8x16xf32>
    %cst_70 = arith.constant dense<0.000000e+00> : vector<8x3xf32>
    %149 = tpu.matmul %148, %12, %cst_70 {dimension_numbers = #tpu.dot_dimension_numbers<[1], [0], [0], [1], [0, 0, 1, 1], [], []>} : vector<8x16xf32>, vector<16x3xf32>, vector<8x3xf32> -> vector<8x3xf32>
    %150 = vector.broadcast %13 : vector<1x3xf32> to vector<8x3xf32>
    %151 = arith.addf %149, %150 : vector<8x3xf32>
    %152 = vector.extract_strided_slice %5 {offsets = [6, 0], sizes = [1, 64], strides = [1, 1]} : vector<9x64xf32> to vector<1x64xf32>
    %153 = vector.broadcast %152 : vector<1x64xf32> to vector<8x64xf32>
    %154 = arith.addf %3, %153 : vector<8x64xf32>
    %cst_71 = arith.constant 0.000000e+00 : f32
    %155 = vector.broadcast %cst_71 : f32 to vector<8x64xf32>
    %156 = arith.maximumf %154, %155 : vector<8x64xf32>
    %cst_72 = arith.constant dense<0.000000e+00> : vector<8x32xf32>
    %157 = tpu.matmul %156, %6, %cst_72 {dimension_numbers = #tpu.dot_dimension_numbers<[1], [0], [0], [1], [0, 0, 1, 1], [], []>} : vector<8x64xf32>, vector<64x32xf32>, vector<8x32xf32> -> vector<8x32xf32>
    %158 = vector.broadcast %7 : vector<1x32xf32> to vector<8x32xf32>
    %159 = arith.addf %157, %158 : vector<8x32xf32>
    %cst_73 = arith.constant 0.000000e+00 : f32
    %160 = vector.broadcast %cst_73 : f32 to vector<8x32xf32>
    %161 = arith.maximumf %159, %160 : vector<8x32xf32>
    %cst_74 = arith.constant dense<0.000000e+00> : vector<8x32xf32>
    %162 = tpu.matmul %161, %8, %cst_74 {dimension_numbers = #tpu.dot_dimension_numbers<[1], [0], [0], [1], [0, 0, 1, 1], [], []>} : vector<8x32xf32>, vector<32x32xf32>, vector<8x32xf32> -> vector<8x32xf32>
    %163 = vector.broadcast %9 : vector<1x32xf32> to vector<8x32xf32>
    %164 = arith.addf %162, %163 : vector<8x32xf32>
    %cst_75 = arith.constant 0.000000e+00 : f32
    %165 = vector.broadcast %cst_75 : f32 to vector<8x32xf32>
    %166 = arith.maximumf %164, %165 : vector<8x32xf32>
    %cst_76 = arith.constant dense<0.000000e+00> : vector<8x16xf32>
    %167 = tpu.matmul %166, %10, %cst_76 {dimension_numbers = #tpu.dot_dimension_numbers<[1], [0], [0], [1], [0, 0, 1, 1], [], []>} : vector<8x32xf32>, vector<32x16xf32>, vector<8x16xf32> -> vector<8x16xf32>
    %168 = vector.broadcast %11 : vector<1x16xf32> to vector<8x16xf32>
    %169 = arith.addf %167, %168 : vector<8x16xf32>
    %cst_77 = arith.constant 0.000000e+00 : f32
    %170 = vector.broadcast %cst_77 : f32 to vector<8x16xf32>
    %171 = arith.maximumf %169, %170 : vector<8x16xf32>
    %cst_78 = arith.constant dense<0.000000e+00> : vector<8x3xf32>
    %172 = tpu.matmul %171, %12, %cst_78 {dimension_numbers = #tpu.dot_dimension_numbers<[1], [0], [0], [1], [0, 0, 1, 1], [], []>} : vector<8x16xf32>, vector<16x3xf32>, vector<8x3xf32> -> vector<8x3xf32>
    %173 = vector.broadcast %13 : vector<1x3xf32> to vector<8x3xf32>
    %174 = arith.addf %172, %173 : vector<8x3xf32>
    %175 = vector.extract_strided_slice %5 {offsets = [7, 0], sizes = [1, 64], strides = [1, 1]} : vector<9x64xf32> to vector<1x64xf32>
    %176 = vector.broadcast %175 : vector<1x64xf32> to vector<8x64xf32>
    %177 = arith.addf %3, %176 : vector<8x64xf32>
    %cst_79 = arith.constant 0.000000e+00 : f32
    %178 = vector.broadcast %cst_79 : f32 to vector<8x64xf32>
    %179 = arith.maximumf %177, %178 : vector<8x64xf32>
    %cst_80 = arith.constant dense<0.000000e+00> : vector<8x32xf32>
    %180 = tpu.matmul %179, %6, %cst_80 {dimension_numbers = #tpu.dot_dimension_numbers<[1], [0], [0], [1], [0, 0, 1, 1], [], []>} : vector<8x64xf32>, vector<64x32xf32>, vector<8x32xf32> -> vector<8x32xf32>
    %181 = vector.broadcast %7 : vector<1x32xf32> to vector<8x32xf32>
    %182 = arith.addf %180, %181 : vector<8x32xf32>
    %cst_81 = arith.constant 0.000000e+00 : f32
    %183 = vector.broadcast %cst_81 : f32 to vector<8x32xf32>
    %184 = arith.maximumf %182, %183 : vector<8x32xf32>
    %cst_82 = arith.constant dense<0.000000e+00> : vector<8x32xf32>
    %185 = tpu.matmul %184, %8, %cst_82 {dimension_numbers = #tpu.dot_dimension_numbers<[1], [0], [0], [1], [0, 0, 1, 1], [], []>} : vector<8x32xf32>, vector<32x32xf32>, vector<8x32xf32> -> vector<8x32xf32>
    %186 = vector.broadcast %9 : vector<1x32xf32> to vector<8x32xf32>
    %187 = arith.addf %185, %186 : vector<8x32xf32>
    %cst_83 = arith.constant 0.000000e+00 : f32
    %188 = vector.broadcast %cst_83 : f32 to vector<8x32xf32>
    %189 = arith.maximumf %187, %188 : vector<8x32xf32>
    %cst_84 = arith.constant dense<0.000000e+00> : vector<8x16xf32>
    %190 = tpu.matmul %189, %10, %cst_84 {dimension_numbers = #tpu.dot_dimension_numbers<[1], [0], [0], [1], [0, 0, 1, 1], [], []>} : vector<8x32xf32>, vector<32x16xf32>, vector<8x16xf32> -> vector<8x16xf32>
    %191 = vector.broadcast %11 : vector<1x16xf32> to vector<8x16xf32>
    %192 = arith.addf %190, %191 : vector<8x16xf32>
    %cst_85 = arith.constant 0.000000e+00 : f32
    %193 = vector.broadcast %cst_85 : f32 to vector<8x16xf32>
    %194 = arith.maximumf %192, %193 : vector<8x16xf32>
    %cst_86 = arith.constant dense<0.000000e+00> : vector<8x3xf32>
    %195 = tpu.matmul %194, %12, %cst_86 {dimension_numbers = #tpu.dot_dimension_numbers<[1], [0], [0], [1], [0, 0, 1, 1], [], []>} : vector<8x16xf32>, vector<16x3xf32>, vector<8x3xf32> -> vector<8x3xf32>
    %196 = vector.broadcast %13 : vector<1x3xf32> to vector<8x3xf32>
    %197 = arith.addf %195, %196 : vector<8x3xf32>
    %198 = vector.extract_strided_slice %5 {offsets = [8, 0], sizes = [1, 64], strides = [1, 1]} : vector<9x64xf32> to vector<1x64xf32>
    %199 = vector.broadcast %198 : vector<1x64xf32> to vector<8x64xf32>
    %200 = arith.addf %3, %199 : vector<8x64xf32>
    %cst_87 = arith.constant 0.000000e+00 : f32
    %201 = vector.broadcast %cst_87 : f32 to vector<8x64xf32>
    %202 = arith.maximumf %200, %201 : vector<8x64xf32>
    %cst_88 = arith.constant dense<0.000000e+00> : vector<8x32xf32>
    %203 = tpu.matmul %202, %6, %cst_88 {dimension_numbers = #tpu.dot_dimension_numbers<[1], [0], [0], [1], [0, 0, 1, 1], [], []>} : vector<8x64xf32>, vector<64x32xf32>, vector<8x32xf32> -> vector<8x32xf32>
    %204 = vector.broadcast %7 : vector<1x32xf32> to vector<8x32xf32>
    %205 = arith.addf %203, %204 : vector<8x32xf32>
    %cst_89 = arith.constant 0.000000e+00 : f32
    %206 = vector.broadcast %cst_89 : f32 to vector<8x32xf32>
    %207 = arith.maximumf %205, %206 : vector<8x32xf32>
    %cst_90 = arith.constant dense<0.000000e+00> : vector<8x32xf32>
    %208 = tpu.matmul %207, %8, %cst_90 {dimension_numbers = #tpu.dot_dimension_numbers<[1], [0], [0], [1], [0, 0, 1, 1], [], []>} : vector<8x32xf32>, vector<32x32xf32>, vector<8x32xf32> -> vector<8x32xf32>
    %209 = vector.broadcast %9 : vector<1x32xf32> to vector<8x32xf32>
    %210 = arith.addf %208, %209 : vector<8x32xf32>
    %cst_91 = arith.constant 0.000000e+00 : f32
    %211 = vector.broadcast %cst_91 : f32 to vector<8x32xf32>
    %212 = arith.maximumf %210, %211 : vector<8x32xf32>
    %cst_92 = arith.constant dense<0.000000e+00> : vector<8x16xf32>
    %213 = tpu.matmul %212, %10, %cst_92 {dimension_numbers = #tpu.dot_dimension_numbers<[1], [0], [0], [1], [0, 0, 1, 1], [], []>} : vector<8x32xf32>, vector<32x16xf32>, vector<8x16xf32> -> vector<8x16xf32>
    %214 = vector.broadcast %11 : vector<1x16xf32> to vector<8x16xf32>
    %215 = arith.addf %213, %214 : vector<8x16xf32>
    %cst_93 = arith.constant 0.000000e+00 : f32
    %216 = vector.broadcast %cst_93 : f32 to vector<8x16xf32>
    %217 = arith.maximumf %215, %216 : vector<8x16xf32>
    %cst_94 = arith.constant dense<0.000000e+00> : vector<8x3xf32>
    %218 = tpu.matmul %217, %12, %cst_94 {dimension_numbers = #tpu.dot_dimension_numbers<[1], [0], [0], [1], [0, 0, 1, 1], [], []>} : vector<8x16xf32>, vector<16x3xf32>, vector<8x3xf32> -> vector<8x3xf32>
    %219 = vector.broadcast %13 : vector<1x3xf32> to vector<8x3xf32>
    %220 = arith.addf %218, %219 : vector<8x3xf32>
    %221 = tpu.concatenate %36, %59, %82, %105, %128, %151, %174, %197, %220 in 1 : vector<8x3xf32>, vector<8x3xf32>, vector<8x3xf32>, vector<8x3xf32>, vector<8x3xf32>, vector<8x3xf32>, vector<8x3xf32>, vector<8x3xf32>, vector<8x3xf32> -> vector<8x27xf32>
    %c0_95 = arith.constant 0 : index
    %c0_96 = arith.constant 0 : index
    %c0_97 = arith.constant 0 : index
    %222 = vector.load %arg13[%c0_95, %c0_96, %c0_97] : memref<1x8x27xf32, #tpu.memory_space<vmem>>, vector<1x8x27xf32>
    %223 = vector.shape_cast %222 : vector<1x8x27xf32> to vector<8x27xf32>
    %224 = vector.shape_cast %221 : vector<8x27xf32> to vector<1x8x27xf32>
    tpu.vector_store %arg13[%c0_95, %c0_96, %c0_97], %224 {strides = array<i32>} : memref<1x8x27xf32, #tpu.memory_space<vmem>>, vector<1x8x27xf32>,
    return
  }
  func.func @transform_0(%arg0: i32, %arg1: i32) -> (i32, i32, i32) {
    %c0_i32 = arith.constant 0 : i32
    %c0_i32_0 = arith.constant 0 : i32
    return %arg0, %arg1, %c0_i32 : i32, i32, i32
  }
  func.func @transform_1(%arg0: i32, %arg1: i32) -> (i32, i32, i32) {
    %c0_i32 = arith.constant 0 : i32
    %c0_i32_0 = arith.constant 0 : i32
    %c0_i32_1 = arith.constant 0 : i32
    return %arg0, %c0_i32, %c0_i32_0 : i32, i32, i32
  }
  func.func @transform_2(%arg0: i32, %arg1: i32) -> (i32, i32) {
    %c0_i32 = arith.constant 0 : i32
    %c0_i32_0 = arith.constant 0 : i32
    %c0_i32_1 = arith.constant 0 : i32
    return %c0_i32, %c0_i32_0 : i32, i32
  }
  func.func @transform_3(%arg0: i32, %arg1: i32) -> (i32, i32) {
    %c0_i32 = arith.constant 0 : i32
    %c0_i32_0 = arith.constant 0 : i32
    %c0_i32_1 = arith.constant 0 : i32
    return %c0_i32, %c0_i32_0 : i32, i32
  }
  func.func @transform_4(%arg0: i32, %arg1: i32) -> (i32, i32) {
    %c0_i32 = arith.constant 0 : i32
    %c0_i32_0 = arith.constant 0 : i32
    %c0_i32_1 = arith.constant 0 : i32
    return %c0_i32, %c0_i32_0 : i32, i32
  }
  func.func @transform_5(%arg0: i32, %arg1: i32) -> (i32, i32) {
    %c0_i32 = arith.constant 0 : i32
    %c0_i32_0 = arith.constant 0 : i32
    %c0_i32_1 = arith.constant 0 : i32
    return %c0_i32, %c0_i32_0 : i32, i32
  }
  func.func @transform_6(%arg0: i32, %arg1: i32) -> (i32, i32) {
    %c0_i32 = arith.constant 0 : i32
    %c0_i32_0 = arith.constant 0 : i32
    %c0_i32_1 = arith.constant 0 : i32
    return %c0_i32, %c0_i32_0 : i32, i32
  }
  func.func @transform_7(%arg0: i32, %arg1: i32) -> (i32, i32) {
    %c0_i32 = arith.constant 0 : i32
    %c0_i32_0 = arith.constant 0 : i32
    %c0_i32_1 = arith.constant 0 : i32
    return %c0_i32, %c0_i32_0 : i32, i32
  }
  func.func @transform_8(%arg0: i32, %arg1: i32) -> (i32, i32) {
    %c0_i32 = arith.constant 0 : i32
    %c0_i32_0 = arith.constant 0 : i32
    %c0_i32_1 = arith.constant 0 : i32
    return %c0_i32, %c0_i32_0 : i32, i32
  }
  func.func @transform_9(%arg0: i32, %arg1: i32) -> (i32, i32) {
    %c0_i32 = arith.constant 0 : i32
    %c0_i32_0 = arith.constant 0 : i32
    %c0_i32_1 = arith.constant 0 : i32
    return %c0_i32, %c0_i32_0 : i32, i32
  }
  func.func @transform_10(%arg0: i32, %arg1: i32) -> (i32, i32) {
    %c0_i32 = arith.constant 0 : i32
    %c0_i32_0 = arith.constant 0 : i32
    %c0_i32_1 = arith.constant 0 : i32
    return %c0_i32, %c0_i32_0 : i32, i32
  }
  func.func @transform_11(%arg0: i32, %arg1: i32) -> (i32, i32, i32) {
    %c0_i32 = arith.constant 0 : i32
    %c0_i32_0 = arith.constant 0 : i32
    return %arg0, %arg1, %c0_i32 : i32, i32, i32
  }
}

</mosaic_0001>

<bundles_post_ra>
// kernel: decoder_all_forward.1
= control target key start
LH: loop header
LB: loop body
LE: loop exit
PB: predicated region body
PF: predicated region fallthrough
CT: control target
= control target key end

     0   :  { %s1696_s17 = smov 0   ;;  %s1698_s18 = smov 0   ;;  %s2125_s0 = inlined_call_operand.vmem [shape: f32[4,8,32], index: 0, kind: input, shape index: {}]   ;;  %s2126_s1 = inlined_call_operand.vmem [shape: f32[4,9,64], index: 1, kind: input, shape index: {}]   ;;  %s2127_s2 = inlined_call_operand.vmem [shape: f32[32,64], index: 2, kind: input, shape index: {}]   ;;  %s2128_s3 = inlined_call_operand.vmem [shape: f32[64,32], index: 3, kind: input, shape index: {}]   ;;  %s2129_s4 = inlined_call_operand.vmem [shape: f32[1,32], index: 4, kind: input, shape index: {}]   ;;  %s2130_s5 = inlined_call_operand.vmem [shape: f32[32,32], index: 5, kind: input, shape index: {}]   ;;  %s2131_s6 = inlined_call_operand.vmem [shape: f32[1,32], index: 6, kind: input, shape index: {}]   ;;  %s2132_s7 = inlined_call_operand.vmem [shape: f32[32,16], index: 7, kind: input, shape index: {}]   ;;  %s2133_s8 = inlined_call_operand.vmem [shape: f32[1,16], index: 8, kind: input, shape index: {}]   ;;  %s2134_s9 = inlined_call_operand.vmem [shape: f32[16,3], index: 9, kind: input, shape index: {}]   ;;  %s2135_s10 = inlined_call_operand.vmem [shape: f32[1,3], index: 10, kind: input, shape index: {}]   ;;  %s2136_s11 = inlined_call_operand.vmem [shape: f32[4,8,27], index: 11, kind: output, shape index: {}]  }
   0x1   :  { %s1700_s19 = smov 0  }
   0x2 LB: > { %s33_s20 = sadd.s32 1, %s1622_s18  ;;  %p1522_p0 = scmp.ge.s32.totalorder %s1626_s19, 1  ;;  %s1626_s19 = sphi %s1700_s19, %s21_s19   ;;  %s1622_s18 = sphi %s1698_s18, %s2138_s18   ;;  %s1618_s17 = sphi %s1696_s17, %s2137_s17  }
   0x3   : > { %p35_p1 = scmp.ge.s32.totalorder %s33_s20, 4  ;;  %p365_p2 = scmp.lt.s32.totalorder %s1626_s19, 5 }
   0x5   : > { %s2140_s20 = smov (%p35_p1, %s33_s20), 0  ;;  %p366_p3 = pnand %p1522_p0, %p365_p2 }
   0x6   : > { %p414_p4 = scmp.lt.s32.totalorder (!%p366_p3), %s1618_s17, 3  ;;  %s1628_s26 = smov (!%p366_p3), 3  }
   0x7   : > { %369 = sbr.rel (%p366_p3) target bundleno = 1925 (0x785), region = 64  ;;  %s1629_s28 = smov (!%p366_p3), 6  }
   0x8   : > { %s1630_s29 = smov (!%p366_p3), 9   ;;  %s1631_s30 = smov (!%p366_p3), 12  }
   0x9   : > { %s1633_s12 = smov (!%p366_p3), 18   ;;  %s1634_s13 = smov (!%p366_p3), 21  }
   0xa   : > { %s1635_s14 = smov (!%p366_p3), 24  }
   0xc   : > { %v437_v0 = vld [vmem:[%s2127_s2 + $0x18] sm:$0xff]  ;;  %v436_v1 = vld [vmem:[%s2127_s2 + $0x10] sm:$0xff]  ;;  %v435_v4 = vld [vmem:[%s2127_s2 + $0x8] sm:$0xff]  ;;  %s2142_s17 = smov (!%p414_p4, %s1618_s17), 3  ;;  %vm438_vm0 = vcmask 261120   ;;  %vm492_vm1 = vcmask 523264  }
   0xd   : > { %454 = vmatpush.msra.mxu0 %v437_v0  ;;  %v1723_v2 = vld [vmem:[%s2128_s3 + $0x38] sm:$0xff]  ;;  %v1728_v3 = vld [vmem:[%s2128_s3 + $0x30] sm:$0xff]  ;;  %v1739_v5 = vld [vmem:[%s2128_s3 + $0x28] sm:$0xff]  ;;  %s1523_s16 = sshll.u32 %s2142_s17, 3  ;;  %s1566_s21 = sshll.u32 %s2142_s17, 4  ;;  %vm574_vm2 = vcmask 130048  }
   0xe   : > { %504 = vmatpush.msra.mxu1 %v1723_v2  ;;  %v434_v6 = vld [vmem:[%s2127_s2] sm:$0xff]  ;;  %s420_s24 = scalar_lea.vmem %s2125_s0, %s1523_s16  ;;  %s1755_s27 = scalar_lea.vmem %s2126_s1, %s1566_s21  ;;  %v1766_v9 = vld [vmem:[%s2128_s3 + $0x18] sm:$0xff]  ;;  %v1774_v10 = vld [vmem:[%s2128_s3 + $0x10] sm:$0xff]  ;;  %vm1414_vm3 = vcmask 23552   ;;  %vm1416_vm4 = vcmask 48128   ;;  %vm1418_vm5 = vcmask 72704  }
   0xf   : > { %455 = vmatpush.msra.mxu0 %v436_v1  ;;  %v1760_v7 = vld [vmem:[%s2128_s3 + $0x20] sm:$0xff]  ;;  %v1780_v11 = vld [vmem:[%s2128_s3 + $0x8] sm:$0xff]  ;;  %v1792_v13 = vld [vmem:[%s2130_s5 + $0x18] sm:$0xff]  ;;  %vm1420_vm6 = vcmask 97280   ;;  %vm1422_vm7 = vcmask 121856   ;;  %vm1424_vm8 = vcmask 146432   ;;  %s432_s22 = scalar_lea.vmem %s2136_s11, %s1523_s16 }
  0x10   : > { %505 = vmatpush.msra.mxu1 %v1728_v3  ;;  %v433_v8 = vld [vmem:[%s420_s24] sm:$0xff]  ;;  %v1797_v14 = vld [vmem:[%s2130_s5 + $0x10] sm:$0xff]  ;;  %535 = vmatpush.msra.mxu2 %v1792_v13  ;;  %v1803_v15 = vld [vmem:[%s2130_s5 + $0x8] sm:$0xff]  ;;  %vm1426_vm9 = vcmask 171008   ;;  %vm1428_vm10 = vcmask 195584   ;;  %vm1430_vm11 = vcmask 220160  }
  0x11   : > { %456 = vmatpush.msra.mxu0 %v435_v4  ;;  %v1785_v12 = vld [vmem:[%s2128_s3] sm:$0xff]  ;;  %v1832_v22 = vld [vmem:[%s2132_s7 + $0x18] sm:$0xff]  ;;  %v1837_v23 = vld [vmem:[%s2132_s7 + $0x10] sm:$0xff] }
  0x12   : > { %506 = vmatpush.msra.mxu1 %v1739_v5  ;;  %536 = vmatpush.msra.mxu2 %v1797_v14  ;;  %v1809_v16 = vld [vmem:[%s2130_s5] sm:$0xff]  ;;  %v1843_v24 = vld [vmem:[%s2132_s7 + $0x8] sm:$0xff] }
  0x13   : > { %457 = vmatpush.msra.mxu0 %v434_v6  ;;  %v1821_v17 = vld [vmem:[%s1755_s27] sm:$0xff]  ;;  %562 = vmatpush.msra.mxu3 %v1832_v22  ;;  %v1870_v33 = vld [vmem:[%s2134_s9 + $0x8] sm:$0xff] }
  0x14   : > { %1527 = vmatmul.msk.f32.vlgmr.msra.gmra.mxu0 %vm438_vm0, %v433_v8  ;;  %507 = vmatpush.msra.mxu1 %v1760_v7  ;;  %v486_v18 = vperm.slane %v1821_v17, 0  ;;  %v1849_v25 = vld [vmem:[%s2132_s7] sm:$0xff]  ;;  %v598_v30 = vperm.slane %v1821_v17, 1  ;;  %v696_v42 = vperm.slane %v1821_v17, 2  ;;  %v794_v55 = vperm.slane %v1821_v17, 3 }
  0x15   : > { %537 = vmatpush.msra.mxu2 %v1803_v15  ;;  %563 = vmatpush.msra.mxu3 %v1837_v23  ;;  %v1860_v26 = vld [vmem:[%s2129_s4] ss:$0 sm:$0xff]  ;;  %v892_v8 = vperm.slane %v1821_v17, 4 }
  0x16   : > { %508 = vmatpush.msra.mxu1 %v1766_v9  ;;  %v1875_v34 = vld [vmem:[%s2134_s9] sm:$0xff]  ;;  %592 = vmatpush.msrb.mxu0 %v1870_v33 }
  0x17   : > { %538 = vmatpush.msra.mxu2 %v1809_v16  ;;  %564 = vmatpush.msra.mxu3 %v1843_v24  ;;  %v1891_v35 = vld [vmem:[%s2131_s6] ss:$0 sm:$0xff] }
  0x18   : > { %509 = vmatpush.msra.mxu1 %v1774_v10  ;;  %593 = vmatpush.msrb.mxu0 %v1875_v34  ;;  %v1924_v45 = vld [vmem:[%s2133_s8] ss:$0 sm:$0xff] }
  0x19   : > { %612 = vmatpush.msrb.mxu2 %v1723_v2  ;;  %565 = vmatpush.msra.mxu3 %v1849_v25 }
  0x1a   : > { %510 = vmatpush.msra.mxu1 %v1780_v11  ;;  %664 = vmatpush.msra.mxu0 %v1832_v22 }
  0x1b   : > { %613 = vmatpush.msrb.mxu2 %v1728_v3  ;;  %640 = vmatpush.msrb.mxu3 %v1792_v13 }
  0x1c   : > { %511 = vmatpush.msra.mxu1 %v1785_v12  ;;  %665 = vmatpush.msra.mxu0 %v1837_v23 }
  0x1d   : > { %614 = vmatpush.msrb.mxu2 %v1739_v5  ;;  %641 = vmatpush.msrb.mxu3 %v1797_v14 }
  0x1e   : > { %690 = vmatpush.msrb.mxu1 %v1870_v33  ;;  %666 = vmatpush.msra.mxu0 %v1843_v24 }
  0x1f   : > { %615 = vmatpush.msrb.mxu2 %v1760_v7  ;;  %642 = vmatpush.msrb.mxu3 %v1803_v15 }
  0x20   : > { %691 = vmatpush.msrb.mxu1 %v1875_v34  ;;  %667 = vmatpush.msra.mxu0 %v1849_v25 }
  0x21   : > { %616 = vmatpush.msrb.mxu2 %v1766_v9  ;;  %643 = vmatpush.msrb.mxu3 %v1809_v16 }
  0x23   : > { %617 = vmatpush.msrb.mxu2 %v1774_v10 }
  0x25   : > { %618 = vmatpush.msrb.mxu2 %v1780_v11 }
  0x27   : > { %619 = vmatpush.msrb.mxu2 %v1785_v12 }
  0x91   : > { %v1825_v19 = vpop.f32.mrf.mxu0 }
  0x92   : > { %v487_v20 = vadd.f32 %v486_v18, %v1825_v19  ;;  %v599_v31 = vadd.f32 %v598_v30, %v1825_v19  ;;  %v697_v43 = vadd.f32 %v696_v42, %v1825_v19  ;;  %v795_v56 = vadd.f32 %v794_v55, %v1825_v19 }
  0x93   : > { %v893_v18 = vadd.f32 %v892_v8, %v1825_v19 }
  0x94   : > { %v488_v21 = vmax.f32 %v487_v20, 0.0  ;;  %v600_v32 = vmax.f32 %v599_v31, 0.0  ;;  %v698_v44 = vmax.f32 %v697_v43, 0.0  ;;  %v796_v57 = vmax.f32 %v795_v56, 0.0 }
  0x95   : > { %v894_v20 = vmax.f32 %v893_v18, 0.0  ;;  %v1088_v56 = vperm.slane %v1821_v17, 6 }
  0x96   : > { %1528 = vmatmul.msk.f32.vlgmr.msra.gmra.mxu1 %vm492_vm1, %v488_v21  ;;  %v1985_v21 = vld [vmem:[%s2135_s10] ss:$0 sm:$0xff] }
  0x97   : > { %762 = vmatpush.msra.mxu1 %v1832_v22 }
  0x99   : > { %763 = vmatpush.msra.mxu1 %v1837_v23 }
  0x9b   : > { %764 = vmatpush.msra.mxu1 %v1843_v24 }
  0x9d   : > { %765 = vmatpush.msra.mxu1 %v1849_v25 }
 0x113   : > { %v513_v27 = vpop.f32.mrf.mxu1 }
 0x114   : > { %v514_v28 = vadd.f32 %v1860_v26, %v513_v27 }
 0x116   : > { %v516_v29 = vmax.f32 %v514_v28, 0.0 }
 0x118   : > { %1529 = vmatmul.msk.f32.vlgmr.msra.gmra.mxu2 %vm438_vm0, %v516_v29 }
 0x119   : > { %788 = vmatpush.msra.mxu2 %v1870_v33 }
 0x11b   : > { %789 = vmatpush.msra.mxu2 %v1875_v34 }
 0x120   : > { %1532 = vmatmul.msk.f32.vlgmr.msrb.gmra.mxu2 %vm492_vm1, %v600_v32 }
 0x121   : > { %860 = vmatpush.msrb.mxu2 %v1832_v22 }
 0x123   : > { %861 = vmatpush.msrb.mxu2 %v1837_v23 }
 0x125   : > { %862 = vmatpush.msrb.mxu2 %v1843_v24 }
 0x127   : > { %863 = vmatpush.msrb.mxu2 %v1849_v25 }
 0x19b   : > { %v540_v36 = vpop.f32.mrf.mxu2 }
 0x19c   : > { %v541_v37 = vadd.f32 %v1891_v35, %v540_v36 }
 0x19e   : > { %v543_v38 = vmax.f32 %v541_v37, 0.0 }
 0x1a0   : > { %1530 = vmatmul.msk.f32.vlgmr.msra.gmra.mxu3 %vm438_vm0, %v543_v38 }
 0x1a1   : > { %710 = vmatpush.msra.mxu3 %v1723_v2 }
 0x1a3   : > { %v621_v39 = vpop.f32.mrf.mxu2  ;;  %711 = vmatpush.msra.mxu3 %v1728_v3 }
 0x1a4   : > { %v622_v40 = vadd.f32 %v1860_v26, %v621_v39 }
 0x1a5   : > { %712 = vmatpush.msra.mxu3 %v1739_v5 }
 0x1a6   : > { %v624_v41 = vmax.f32 %v622_v40, 0.0 }
 0x1a7   : > { %713 = vmatpush.msra.mxu3 %v1760_v7 }
 0x1a8   : > { %1533 = vmatmul.msk.f32.vlgmr.msrb.gmra.mxu3 %vm438_vm0, %v624_v41  ;;  %v990_v41 = vperm.slane %v1821_v17, 5 }
 0x1a9   : > { %714 = vmatpush.msra.mxu3 %v1766_v9 }
 0x1aa   : > { %v991_v42 = vadd.f32 %v990_v41, %v1825_v19 }
 0x1ab   : > { %715 = vmatpush.msra.mxu3 %v1774_v10 }
 0x1ac   : > { %v992_v43 = vmax.f32 %v991_v42, 0.0 }
 0x1ad   : > { %716 = vmatpush.msra.mxu3 %v1780_v11 }
 0x1af   : > { %717 = vmatpush.msra.mxu3 %v1785_v12 }
 0x1b0   : > { %1536 = vmatmul.msk.f32.vlgmr.msra.gmra.mxu3 %vm492_vm1, %v698_v44 }
 0x1b1   : > { %886 = vmatpush.msrb.mxu3 %v1870_v33 }
 0x1b3   : > { %887 = vmatpush.msrb.mxu3 %v1875_v34 }
 0x1b5   : > { %958 = vmatpush.msra.mxu3 %v1832_v22 }
 0x1b7   : > { %959 = vmatpush.msra.mxu3 %v1837_v23 }
 0x1b9   : > { %960 = vmatpush.msra.mxu3 %v1843_v24 }
 0x1bb   : > { %961 = vmatpush.msra.mxu3 %v1849_v25 }
 0x223   : > { %v567_v46 = vpop.f32.mrf.mxu3 }
 0x224   : > { %v568_v47 = vadd.f32 %v1924_v45, %v567_v46 }
 0x226   : > { %v570_v48 = vmax.f32 %v568_v47, 0.0 }
 0x228   : > { %1531 = vmatmul.msk.f32.vlgmr.msrb.gmra.mxu0 %vm574_vm2, %v570_v48 }
 0x229   : > { %738 = vmatpush.msrb.mxu0 %v1792_v13 }
 0x22b   : > { %v645_v49 = vpop.f32.mrf.mxu3  ;;  %739 = vmatpush.msrb.mxu0 %v1797_v14 }
 0x22c   : > { %v646_v50 = vadd.f32 %v1891_v35, %v645_v49 }
 0x22d   : > { %740 = vmatpush.msrb.mxu0 %v1803_v15 }
 0x22e   : > { %v648_v51 = vmax.f32 %v646_v50, 0.0 }
 0x22f   : > { %741 = vmatpush.msrb.mxu0 %v1809_v16 }
 0x230   : > { %1534 = vmatmul.msk.f32.vlgmr.msra.gmra.mxu0 %vm438_vm0, %v648_v51 }
 0x231   : > { %808 = vmatpush.msra.mxu0 %v1723_v2 }
 0x233   : > { %v719_v52 = vpop.f32.mrf.mxu3  ;;  %809 = vmatpush.msra.mxu0 %v1728_v3 }
 0x234   : > { %v720_v53 = vadd.f32 %v1860_v26, %v719_v52 }
 0x235   : > { %810 = vmatpush.msra.mxu0 %v1739_v5 }
 0x236   : > { %v722_v54 = vmax.f32 %v720_v53, 0.0 }
 0x237   : > { %811 = vmatpush.msra.mxu0 %v1760_v7 }
 0x238   : > { %1537 = vmatmul.msk.f32.vlgmr.msrb.gmra.mxu0 %vm438_vm0, %v722_v54 }
 0x239   : > { %812 = vmatpush.msra.mxu0 %v1766_v9 }
 0x23b   : > { %813 = vmatpush.msra.mxu0 %v1774_v10 }
 0x23d   : > { %814 = vmatpush.msra.mxu0 %v1780_v11 }
 0x23f   : > { %815 = vmatpush.msra.mxu0 %v1785_v12 }
 0x240   : > { %1540 = vmatmul.msk.f32.vlgmr.msra.gmra.mxu0 %vm492_vm1, %v796_v57  ;;  %v1089_v57 = vadd.f32 %v1088_v56, %v1825_v19 }
 0x241   : > { %984 = vmatpush.msrb.mxu0 %v1870_v33 }
 0x243   : > { %985 = vmatpush.msrb.mxu0 %v1875_v34 }
 0x245   : > { %1056 = vmatpush.msra.mxu0 %v1832_v22 }
 0x247   : > { %1057 = vmatpush.msra.mxu0 %v1837_v23 }
 0x249   : > { %1058 = vmatpush.msra.mxu0 %v1843_v24 }
 0x24b   : > { %1059 = vmatpush.msra.mxu0 %v1849_v25 }
 0x2a5   : > { %v1953_v58 = vpop.f32.mrf.mxu0 }
 0x2a6   : > { %v596_v56 = vadd.f32 %v1985_v21, %v1953_v58 }
 0x2ad   : > { %v669_v59 = vpop.f32.mrf.mxu0 }
 0x2ae   : > { %v670_v60 = vadd.f32 %v1924_v45, %v669_v59  ;;  %v1090_v59 = vmax.f32 %v1089_v57, 0.0 }
 0x2b0   : > { %v672_v61 = vmax.f32 %v670_v60, 0.0 }
 0x2b2   : > { %1535 = vmatmul.msk.f32.vlgmr.msrb.gmra.mxu1 %vm574_vm2, %v672_v61 }
 0x2b3   : > { %836 = vmatpush.msrb.mxu1 %v1792_v13 }
 0x2b5   : > { %v743_v62 = vpop.f32.mrf.mxu0  ;;  %837 = vmatpush.msrb.mxu1 %v1797_v14 }
 0x2b6   : > { %v744_v63 = vadd.f32 %v1891_v35, %v743_v62 }
 0x2b7   : > { %838 = vmatpush.msrb.mxu1 %v1803_v15 }
 0x2b8   : > { %v746_v0 = vmax.f32 %v744_v63, 0.0 }
 0x2b9   : > { %839 = vmatpush.msrb.mxu1 %v1809_v16 }
 0x2ba   : > { %1538 = vmatmul.msk.f32.vlgmr.msra.gmra.mxu1 %vm438_vm0, %v746_v0 }
 0x2bb   : > { %906 = vmatpush.msra.mxu1 %v1723_v2 }
 0x2bd   : > { %v817_v1 = vpop.f32.mrf.mxu0  ;;  %907 = vmatpush.msra.mxu1 %v1728_v3 }
 0x2be   : > { %v818_v4 = vadd.f32 %v1860_v26, %v817_v1 }
 0x2bf   : > { %908 = vmatpush.msra.mxu1 %v1739_v5 }
 0x2c0   : > { %v820_v6 = vmax.f32 %v818_v4, 0.0 }
 0x2c1   : > { %909 = vmatpush.msra.mxu1 %v1760_v7 }
 0x2c2   : > { %1541 = vmatmul.msk.f32.vlgmr.msrb.gmra.mxu1 %vm438_vm0, %v820_v6  ;;  %v1186_v6 = vperm.slane %v1821_v17, 7 }
 0x2c3   : > { %910 = vmatpush.msra.mxu1 %v1766_v9 }
 0x2c4   : > { %v1187_v8 = vadd.f32 %v1186_v6, %v1825_v19 }
 0x2c5   : > { %911 = vmatpush.msra.mxu1 %v1774_v10 }
 0x2c6   : > { %v1188_v18 = vmax.f32 %v1187_v8, 0.0 }
 0x2c7   : > { %912 = vmatpush.msra.mxu1 %v1780_v11 }
 0x2c9   : > { %913 = vmatpush.msra.mxu1 %v1785_v12 }
 0x2ca   : > { %1544 = vmatmul.msk.f32.vlgmr.msra.gmra.mxu1 %vm492_vm1, %v894_v20 }
 0x2cb   : > { %1082 = vmatpush.msrb.mxu1 %v1870_v33 }
 0x2cd   : > { %1083 = vmatpush.msrb.mxu1 %v1875_v34 }
 0x2cf   : > { %1154 = vmatpush.msra.mxu1 %v1832_v22 }
 0x2d1   : > { %1155 = vmatpush.msra.mxu1 %v1837_v23 }
 0x2d3   : > { %1156 = vmatpush.msra.mxu1 %v1843_v24 }
 0x2d5   : > { %1157 = vmatpush.msra.mxu1 %v1849_v25 }
 0x32f   : > { %v693_v27 = vpop.f32.mrf.mxu1 }
 0x330   : > { %v694_v28 = vadd.f32 %v1985_v21, %v693_v27 }
 0x332   : > { %1383 = vrot.lane.b32.xlu0 %v694_v28, %s1628_s26 }
 0x337   : > { %v767_v29 = vpop.f32.mrf.mxu1 }
 0x338   : > { %v768_v30 = vadd.f32 %v1924_v45, %v767_v29 }
 0x33a   : > { %v770_v31 = vmax.f32 %v768_v30, 0.0 }
 0x33c   : > { %1539 = vmatmul.msk.f32.vlgmr.msra.gmra.mxu2 %vm574_vm2, %v770_v31 }
 0x33d   : > { %934 = vmatpush.msra.mxu2 %v1792_v13 }
 0x33f   : > { %v841_v32 = vpop.f32.mrf.mxu1  ;;  %935 = vmatpush.msra.mxu2 %v1797_v14 }
 0x340   : > { %v842_v36 = vadd.f32 %v1891_v35, %v841_v32 }
 0x341   : > { %936 = vmatpush.msra.mxu2 %v1803_v15 }
 0x342   : > { %v844_v37 = vmax.f32 %v842_v36, 0.0  ;;  %v1599_v36 = vld [vmem:[%s1755_s27 + $0x8] ss:$0 sm:$0xff]  ;;  %s1632_s27 = smov 15  }
 0x343   : > { %937 = vmatpush.msra.mxu2 %v1809_v16 }
 0x344   : > { %1542 = vmatmul.msk.f32.vlgmr.msrb.gmra.mxu2 %vm438_vm0, %v844_v37 }
 0x345   : > { %1004 = vmatpush.msrb.mxu2 %v1723_v2 }
 0x347   : > { %v915_v38 = vpop.f32.mrf.mxu1  ;;  %1005 = vmatpush.msrb.mxu2 %v1728_v3 }
 0x348   : > { %v916_v39 = vadd.f32 %v1860_v26, %v915_v38  ;;  %v1285_v38 = vadd.f32 %v1599_v36, %v1825_v19 }
 0x349   : > { %1006 = vmatpush.msrb.mxu2 %v1739_v5 }
 0x34a   : > { %v918_v40 = vmax.f32 %v916_v39, 0.0 }
 0x34b   : > { %1007 = vmatpush.msrb.mxu2 %v1760_v7 }
 0x34c   : > { %1545 = vmatmul.msk.f32.vlgmr.msra.gmra.mxu2 %vm438_vm0, %v918_v40 }
 0x34d   : > { %1008 = vmatpush.msrb.mxu2 %v1766_v9 }
 0x34f   : > { %1009 = vmatpush.msrb.mxu2 %v1774_v10 }
 0x351   : > { %1010 = vmatpush.msrb.mxu2 %v1780_v11 }
 0x353   : > { %1011 = vmatpush.msrb.mxu2 %v1785_v12 }
 0x354   : > { %1548 = vmatmul.msk.f32.vlgmr.msrb.gmra.mxu2 %vm492_vm1, %v992_v43 }
 0x355   : > { %1180 = vmatpush.msra.mxu2 %v1870_v33 }
 0x357   : > { %1181 = vmatpush.msra.mxu2 %v1875_v34 }
 0x359   : > { %1252 = vmatpush.msrb.mxu2 %v1832_v22 }
 0x35b   : > { %1253 = vmatpush.msrb.mxu2 %v1837_v23 }
 0x35d   : > { %1254 = vmatpush.msrb.mxu2 %v1843_v24 }
 0x35f   : > { %1255 = vmatpush.msrb.mxu2 %v1849_v25 }
 0x3bf   : > { %v791_v44 = vpop.f32.mrf.mxu2 }
 0x3c0   : > { %v792_v46 = vadd.f32 %v1985_v21, %v791_v44 }
 0x3c2   : > { %1387 = vrot.lane.b32.xlu0 %v792_v46, %s1629_s28 }
 0x3c7   : > { %v865_v47 = vpop.f32.mrf.mxu2 }
 0x3c8   : > { %v866_v48 = vadd.f32 %v1924_v45, %v865_v47 }
 0x3ca   : > { %v868_v49 = vmax.f32 %v866_v48, 0.0 }
 0x3cc   : > { %1543 = vmatmul.msk.f32.vlgmr.msrb.gmra.mxu3 %vm574_vm2, %v868_v49 }
 0x3cd   : > { %1032 = vmatpush.msrb.mxu3 %v1792_v13 }
 0x3cf   : > { %v939_v50 = vpop.f32.mrf.mxu2  ;;  %1033 = vmatpush.msrb.mxu3 %v1797_v14 }
 0x3d0   : > { %v940_v51 = vadd.f32 %v1891_v35, %v939_v50 }
 0x3d1   : > { %1034 = vmatpush.msrb.mxu3 %v1803_v15 }
 0x3d2   : > { %v942_v52 = vmax.f32 %v940_v51, 0.0 }
 0x3d3   : > { %1035 = vmatpush.msrb.mxu3 %v1809_v16 }
 0x3d4   : > { %1546 = vmatmul.msk.f32.vlgmr.msra.gmra.mxu3 %vm438_vm0, %v942_v52 }
 0x3d5   : > { %1102 = vmatpush.msra.mxu3 %v1723_v2 }
 0x3d7   : > { %v1013_v53 = vpop.f32.mrf.mxu2  ;;  %1103 = vmatpush.msra.mxu3 %v1728_v3 }
 0x3d8   : > { %v1014_v54 = vadd.f32 %v1860_v26, %v1013_v53 }
 0x3d9   : > { %1104 = vmatpush.msra.mxu3 %v1739_v5 }
 0x3da   : > { %v1016_v55 = vmax.f32 %v1014_v54, 0.0 }
 0x3db   : > { %1105 = vmatpush.msra.mxu3 %v1760_v7 }
 0x3dc   : > { %1549 = vmatmul.msk.f32.vlgmr.msrb.gmra.mxu3 %vm438_vm0, %v1016_v55 }
 0x3dd   : > { %1106 = vmatpush.msra.mxu3 %v1766_v9 }
 0x3df   : > { %1107 = vmatpush.msra.mxu3 %v1774_v10 }
 0x3e1   : > { %1108 = vmatpush.msra.mxu3 %v1780_v11 }
 0x3e3   : > { %1109 = vmatpush.msra.mxu3 %v1785_v12 }
 0x3e4   : > { %1552 = vmatmul.msk.f32.vlgmr.msra.gmra.mxu3 %vm492_vm1, %v1090_v59 }
 0x3e5   : > { %1278 = vmatpush.msrb.mxu3 %v1870_v33 }
 0x3e7   : > { %1279 = vmatpush.msrb.mxu3 %v1875_v34 }
 0x3e9   : > { %1350 = vmatpush.msra.mxu3 %v1832_v22 }
 0x3eb   : > { %1351 = vmatpush.msra.mxu3 %v1837_v23 }
 0x3ed   : > { %1352 = vmatpush.msra.mxu3 %v1843_v24 }
 0x3ef   : > { %1353 = vmatpush.msra.mxu3 %v1849_v25 }
 0x44f   : > { %v889_v60 = vpop.f32.mrf.mxu3 }
 0x450   : > { %v890_v61 = vadd.f32 %v1985_v21, %v889_v60 }
 0x452   : > { %1391 = vrot.lane.b32.xlu1 %v890_v61, %s1630_s29 }
 0x457   : > { %v963_v62 = vpop.f32.mrf.mxu3 }
 0x458   : > { %v964_v63 = vadd.f32 %v1924_v45, %v963_v62 }
 0x45a   : > { %v966_v0 = vmax.f32 %v964_v63, 0.0 }
 0x45c   : > { %1547 = vmatmul.msk.f32.vlgmr.msrb.gmra.mxu0 %vm574_vm2, %v966_v0 }
 0x45d   : > { %1130 = vmatpush.msrb.mxu0 %v1792_v13 }
 0x45f   : > { %v1037_v22 = vpop.f32.mrf.mxu3  ;;  %1131 = vmatpush.msrb.mxu0 %v1797_v14 }
 0x460   : > { %v1038_v23 = vadd.f32 %v1891_v35, %v1037_v22 }
 0x461   : > { %1132 = vmatpush.msrb.mxu0 %v1803_v15 }
 0x462   : > { %v1040_v24 = vmax.f32 %v1038_v23, 0.0 }
 0x463   : > { %1133 = vmatpush.msrb.mxu0 %v1809_v16 }
 0x464   : > { %1550 = vmatmul.msk.f32.vlgmr.msra.gmra.mxu0 %vm438_vm0, %v1040_v24 }
 0x465   : > { %1200 = vmatpush.msra.mxu0 %v1723_v2 }
 0x467   : > { %v1111_v25 = vpop.f32.mrf.mxu3  ;;  %1201 = vmatpush.msra.mxu0 %v1728_v3 }
 0x468   : > { %v1112_v1 = vadd.f32 %v1860_v26, %v1111_v25 }
 0x469   : > { %1202 = vmatpush.msra.mxu0 %v1739_v5 }
 0x46a   : > { %v1114_v4 = vmax.f32 %v1112_v1, 0.0 }
 0x46b   : > { %1203 = vmatpush.msra.mxu0 %v1760_v7 }
 0x46c   : > { %1553 = vmatmul.msk.f32.vlgmr.msrb.gmra.mxu0 %vm438_vm0, %v1114_v4 }
 0x46d   : > { %1204 = vmatpush.msra.mxu0 %v1766_v9 }
 0x46f   : > { %1205 = vmatpush.msra.mxu0 %v1774_v10 }
 0x471   : > { %1206 = vmatpush.msra.mxu0 %v1780_v11 }
 0x473   : > { %1207 = vmatpush.msra.mxu0 %v1785_v12 }
 0x474   : > { %1556 = vmatmul.msk.f32.vlgmr.msra.gmra.mxu0 %vm492_vm1, %v1188_v18 }
 0x475   : > { %1376 = vmatpush.msrb.mxu0 %v1870_v33 }
 0x477   : > { %1377 = vmatpush.msrb.mxu0 %v1875_v34 }
 0x4c4   : > { %v1392_v53 = vpop.permute.xlu1 %1391 }
 0x4d9   : > { %v987_v17 = vpop.f32.mrf.mxu0 }
 0x4da   : > { %v988_v20 = vadd.f32 %v1985_v21, %v987_v17 }
 0x4dc   : > { %1395 = vrot.lane.b32.xlu1 %v988_v20, %s1631_s30 }
 0x4e1   : > { %v1061_v27 = vpop.f32.mrf.mxu0 }
 0x4e2   : > { %v1062_v28 = vadd.f32 %v1924_v45, %v1061_v27 }
 0x4e4   : > { %v1064_v29 = vmax.f32 %v1062_v28, 0.0 }
 0x4e6   : > { %1551 = vmatmul.msk.f32.vlgmr.msrb.gmra.mxu1 %vm574_vm2, %v1064_v29 }
 0x4e7   : > { %1228 = vmatpush.msrb.mxu1 %v1792_v13 }
 0x4e9   : > { %v1135_v30 = vpop.f32.mrf.mxu0  ;;  %1229 = vmatpush.msrb.mxu1 %v1797_v14 }
 0x4ea   : > { %v1136_v33 = vadd.f32 %v1891_v35, %v1135_v30 }
 0x4eb   : > { %1230 = vmatpush.msrb.mxu1 %v1803_v15 }
 0x4ec   : > { %v1138_v34 = vmax.f32 %v1136_v33, 0.0 }
 0x4ed   : > { %1231 = vmatpush.msrb.mxu1 %v1809_v16 }
 0x4ee   : > { %1554 = vmatmul.msk.f32.vlgmr.msra.gmra.mxu1 %vm438_vm0, %v1138_v34 }
 0x4ef   : > { %1298 = vmatpush.msra.mxu1 %v1723_v2  ;;  %v1286_v2 = vmax.f32 %v1285_v38, 0.0 }
 0x4f1   : > { %v1209_v31 = vpop.f32.mrf.mxu0  ;;  %1299 = vmatpush.msra.mxu1 %v1728_v3 }
 0x4f2   : > { %v1210_v32 = vadd.f32 %v1860_v26, %v1209_v31 }
 0x4f3   : > { %1300 = vmatpush.msra.mxu1 %v1739_v5 }
 0x4f4   : > { %v1212_v37 = vmax.f32 %v1210_v32, 0.0 }
 0x4f5   : > { %1301 = vmatpush.msra.mxu1 %v1760_v7 }
 0x4f6   : > { %1557 = vmatmul.msk.f32.vlgmr.msrb.gmra.mxu1 %vm438_vm0, %v1212_v37 }
 0x4f7   : > { %1302 = vmatpush.msra.mxu1 %v1766_v9 }
 0x4f9   : > { %1303 = vmatpush.msra.mxu1 %v1774_v10 }
 0x4fb   : > { %1304 = vmatpush.msra.mxu1 %v1780_v11 }
 0x4fd   : > { %1305 = vmatpush.msra.mxu1 %v1785_v12 }
 0x4fe   : > { %1560 = vmatmul.msk.f32.vlgmr.msra.gmra.mxu1 %vm492_vm1, %v1286_v2 }
 0x54e   : > { %v1396_v57 = vpop.permute.xlu1 %1395 }
 0x563   : > { %v1085_v3 = vpop.f32.mrf.mxu1 }
 0x564   : > { %v1086_v5 = vadd.f32 %v1985_v21, %v1085_v3 }
 0x566   : > { %1399 = vrot.lane.b32.xlu2 %v1086_v5, %s1632_s27 }
 0x56b   : > { %v1159_v7 = vpop.f32.mrf.mxu1 }
 0x56c   : > { %v1160_v39 = vadd.f32 %v1924_v45, %v1159_v7 }
 0x56e   : > { %v1162_v9 = vmax.f32 %v1160_v39, 0.0 }
 0x570   : > { %1555 = vmatmul.msk.f32.vlgmr.msra.gmra.mxu2 %vm574_vm2, %v1162_v9 }
 0x571   : > { %1326 = vmatpush.msra.mxu2 %v1792_v13 }
 0x573   : > { %v1233_v10 = vpop.f32.mrf.mxu1  ;;  %1327 = vmatpush.msra.mxu2 %v1797_v14 }
 0x574   : > { %v1234_v11 = vadd.f32 %v1891_v35, %v1233_v10 }
 0x575   : > { %1328 = vmatpush.msra.mxu2 %v1803_v15 }
 0x576   : > { %v1236_v12 = vmax.f32 %v1234_v11, 0.0 }
 0x577   : > { %1329 = vmatpush.msra.mxu2 %v1809_v16 }
 0x578   : > { %1558 = vmatmul.msk.f32.vlgmr.msrb.gmra.mxu2 %vm438_vm0, %v1236_v12 }
 0x57b   : > { %v1307_v19 = vpop.f32.mrf.mxu1 }
 0x57c   : > { %v1308_v40 = vadd.f32 %v1860_v26, %v1307_v19 }
 0x57e   : > { %v1310_v41 = vmax.f32 %v1308_v40, 0.0 }
 0x580   : > { %1561 = vmatmul.msk.f32.vlgmr.msra.gmra.mxu2 %vm438_vm0, %v1310_v41 }
 0x5c0   : > { %v1400_v54 = vpop.permute.xlu2 %1399 }
 0x5f3   : > { %v1183_v42 = vpop.f32.mrf.mxu2 }
 0x5f4   : > { %v1184_v13 = vadd.f32 %v1985_v21, %v1183_v42 }
 0x5f6   : > { %1403 = vrot.lane.b32.xlu2 %v1184_v13, %s1633_s12 }
 0x5fb   : > { %v1257_v14 = vpop.f32.mrf.mxu2 }
 0x5fc   : > { %v1258_v43 = vadd.f32 %v1924_v45, %v1257_v14 }
 0x5fe   : > { %v1260_v15 = vmax.f32 %v1258_v43, 0.0 }
 0x600   : > { %1559 = vmatmul.msk.f32.vlgmr.msrb.gmra.mxu3 %vm574_vm2, %v1260_v15 }
 0x603   : > { %v1331_v16 = vpop.f32.mrf.mxu2 }
 0x604   : > { %v1332_v44 = vadd.f32 %v1891_v35, %v1331_v16  ;;  %v1384_v35 = vpop.permute.xlu0 %1383 }
 0x606   : > { %v1334_v46 = vmax.f32 %v1332_v44, 0.0 }
 0x608   : > { %1562 = vmatmul.msk.f32.vlgmr.msra.gmra.mxu3 %vm438_vm0, %v1334_v46 }
 0x60c   : > { %v1388_v55 = vpop.permute.xlu0 %1387 }
 0x650   : > { %v1404_v61 = vpop.permute.xlu2 %1403 }
 0x683   : > { %v1281_v26 = vpop.f32.mrf.mxu3 }
 0x684   : > { %v1282_v47 = vadd.f32 %v1985_v21, %v1281_v26 }
 0x686   : > { %1407 = vrot.lane.b32.xlu0 %v1282_v47, %s1634_s13 }
 0x68b   : > { %v1355_v48 = vpop.f32.mrf.mxu3 }
 0x68c   : > { %v1356_v49 = vadd.f32 %v1924_v45, %v1355_v48  ;;  %v1415_v45 = vsel %vm1414_vm3, %v596_v56, %v1384_v35 }
 0x68d   : > { %v1417_v59 = vsel %vm1416_vm4, %v1415_v45, %v1388_v55 }
 0x68e   : > { %v1358_v50 = vmax.f32 %v1356_v49, 0.0  ;;  %v1419_v60 = vsel %vm1418_vm5, %v1417_v59, %v1392_v53 }
 0x68f   : > { %v1421_v62 = vsel %vm1420_vm6, %v1419_v60, %v1396_v57 }
 0x690   : > { %1563 = vmatmul.msk.f32.vlgmr.msrb.gmra.mxu0 %vm574_vm2, %v1358_v50  ;;  %v1423_v0 = vsel %vm1422_vm7, %v1421_v62, %v1400_v54 }
 0x691   : > { %v1425_v58 = vsel %vm1424_vm8, %v1423_v0, %v1404_v61 }
 0x6f8   : > { %v1408_v63 = vpop.permute.xlu0 %1407 }
 0x70d   : > { %v1379_v51 = vpop.f32.mrf.mxu0 }
 0x70e   : > { %v1380_v52 = vadd.f32 %v1985_v21, %v1379_v51  ;;  %v1427_v21 = vsel %vm1426_vm9, %v1425_v58, %v1408_v63 }
 0x710   : > { %1411 = vrot.lane.b32.xlu1 %v1380_v52, %s1635_s14 }
 0x782   : > { %v1412_v22 = vpop.permute.xlu1 %1411 }
 0x783   : > { %v1429_v23 = vsel %vm1428_vm10, %v1427_v21, %v1412_v22 }
 0x784   : > { %1431 = vst.msk [vmem:[%s432_s22] sm:$0xff] %vm1430_vm11, %v1429_v23 }
 0x785 PF: > { %s21_s19 = sadd.s32 1, %s1626_s19   ;;  %s2137_s17 = smov %s1622_s18 }
 0x786   : > { %p18_p5 = scmp.ge.s32.totalorder %s21_s19, 6   ;;  %s2138_s18 = smov %s2140_s20 }
 0x788   :  { %20 = sbr.rel (!%p18_p5) target bundleno = 2 (0x2), region = 97 }

</bundles_post_ra>
